<compile_context>
chip_gen: v7x
topology: tpu7x:2x2x1
jax: 0.10.0
libtpu: 0.0.40
codegen_flags: <defaults>
</compile_context>

<pallas_src>
import jax
import jax.numpy as jnp
from jax.experimental import pallas as pl
from jax.experimental.pallas import tpu as pltpu


def _images_per_tile(n, cin, cout, hw, budget_bytes=8 << 20, kron_cap=512):
    """Images per grid step.

    Constraints:
      * tile row counts (tn*Cin for input, tn*Cout for output) are multiples
        of 8 (Mosaic (8,128) rule) unless the tile spans the full array;
      * in+out tile pair stays under budget_bytes so double-buffered tiles
        plus the small constant inputs fit the 32 MiB scoped VMEM (v7x safe);
      * aim for >=2 grid steps when N allows (pipelining / megacore);
      * tn*Cin <= kron_cap caps the block-diagonal pointwise weight so its
        redundant MXU work / VMEM footprint stays negligible.
    """
    per_img = (cin + cout) * hw * 4
    want = max(1, budget_bytes // per_img)
    if n >= 2:
        want = min(want, max(1, n // 2))
    want = min(want, max(1, kron_cap // max(cin, 1)))
    valid = [d for d in range(1, n + 1)
             if n % d == 0 and (d * cin) % 8 == 0 and (d * cout) % 8 == 0]
    if not valid:
        return n  # single full-extent tile (block shape == full array dims)
    under = [d for d in valid if d <= want]
    return max(under) if under else min(valid)


def block_forward(x_nchw, params):
    """x_nchw: (N, Cin, H, W) float32 -> (N, Cout, H, W) float32."""
    wd, bd, wp, bp, gamma, beta = params
    N, Cin, H, W = x_nchw.shape
    Cout = wp.shape[1]
    HW = H * W
    eps = 1e-5
    f32 = jnp.float32

    # NCHW-native lane-dense view: a pure reshape of contiguous NCHW.
    x2 = x_nchw.reshape(N * Cin, HW)                       # (N*Cin, H*W)

    tn = _images_per_tile(N, Cin, Cout, HW)
    ri, ro = tn * Cin, tn * Cout                           # tile rows in / out
    g = N // tn                                            # grid steps

    # ---- small constant operands (constant index_map, DMA'd once) ----------
    # Lane masks for the (3,1) depthwise H-halo: row layout is h*W + w.
    hh = jnp.arange(HW, dtype=jnp.int32) // W
    masks = jnp.stack([(hh != 0).astype(f32),              # zero the h-1 tap at h==0
                       (hh != H - 1).astype(f32)], axis=0)  # zero the h+1 tap at h==H-1
    # Per-row depthwise taps + bias: row n*Cin + c uses wd[:, c], bd[c].
    wdc = jnp.stack([jnp.tile(wd[0], tn), jnp.tile(wd[1], tn),
                     jnp.tile(wd[2], tn), jnp.tile(bd, tn)], axis=1)   # (ri, 4)
    # Pointwise 1x1 conv as a single MXU matmul per tile (block-diagonal).
    wbig = jnp.kron(jnp.eye(tn, dtype=f32), wp.astype(f32).T)          # (ro, ri)
    bpc = jnp.tile(bp, tn).reshape(ro, 1)                              # (ro, 1)

    def conv_tanh(x_ref, msk_ref, wdc_ref, wbig_ref, bpc_ref):
        """Depthwise (3,1) conv + pointwise 1x1 conv + tanh on one tile."""
        x = x_ref[...]                                     # (ri, HW)
        # H halo lives inside each lane row: shift by +-W lanes (XLU).
        x_up = pltpu.roll(x, shift=W, axis=1) * msk_ref[0:1, :]         # h-1 tap
        x_dn = pltpu.roll(x, shift=HW - W, axis=1) * msk_ref[1:2, :]    # h+1 tap
        y = (x_up * wdc_ref[:, 0:1] + x * wdc_ref[:, 1:2]
             + x_dn * wdc_ref[:, 2:3] + wdc_ref[:, 3:4])
        z = jnp.dot(wbig_ref[...], y, preferred_element_type=jnp.float32)
        return jnp.tanh(z + bpc_ref[...])                  # (ro, HW)

    cparams = pltpu.CompilerParams(
        dimension_semantics=("parallel",),
        vmem_limit_bytes=32 * 1024 * 1024,
    )
    const2 = lambda i: (0, 0)
    row2 = lambda i: (i, 0)
    common_in_specs = [
        pl.BlockSpec((ri, HW), row2),       # x tile
        pl.BlockSpec((2, HW), const2),      # halo masks
        pl.BlockSpec((ri, 4), const2),      # depthwise taps + bias (per row)
        pl.BlockSpec((ro, ri), const2),     # block-diagonal pointwise weight
        pl.BlockSpec((ro, 1), const2),      # pointwise bias (per row)
    ]

    # ---- phase 1: BatchNorm partial statistics (no z write to HBM) ---------
    def stats_kernel(x_ref, msk_ref, wdc_ref, wbig_ref, bpc_ref, st_ref):
        z = conv_tanh(x_ref, msk_ref, wdc_ref, wbig_ref, bpc_ref)
        st_ref[:, 0:1] = jnp.sum(z, axis=1, keepdims=True)
        st_ref[:, 1:2] = jnp.sum(z * z, axis=1, keepdims=True)

    stats = pl.pallas_call(
        stats_kernel,
        grid=(g,),
        out_shape=jax.ShapeDtypeStruct((N * Cout, 2), f32),
        in_specs=common_in_specs,
        out_specs=pl.BlockSpec((ro, 2), row2),
        compiler_params=cparams,
    )(x2, masks, wdc, wbig, bpc)

    # ---- fold partials into per-channel BN scale/shift (tiny XLA op) -------
    # TODO(synk): single-pass E[z^2]-E[z]^2 in f32; fine for tanh-bounded z at
    # these sizes, switch to Welford-style partials for very large N*H*W.
    per = stats.reshape(N, Cout, 2)
    cnt = f32(N * H * W)
    mean = per[..., 0].sum(axis=0) / cnt
    var = jnp.maximum(per[..., 1].sum(axis=0) / cnt - mean * mean, 0.0)
    scale_c = gamma * jax.lax.rsqrt(var + eps)
    shift_c = beta - mean * scale_c
    ssc = jnp.stack([jnp.tile(scale_c, tn), jnp.tile(shift_c, tn)], axis=1)  # (ro, 2)

    # ---- phase 2: recompute conv+tanh and apply the BN affine --------------
    def out_kernel(x_ref, msk_ref, wdc_ref, wbig_ref, bpc_ref, ssc_ref, o_ref):
        z = conv_tanh(x_ref, msk_ref, wdc_ref, wbig_ref, bpc_ref)
        o_ref[...] = z * ssc_ref[:, 0:1] + ssc_ref[:, 1:2]

    out2 = pl.pallas_call(
        out_kernel,
        grid=(g,),
        out_shape=jax.ShapeDtypeStruct((N * Cout, HW), f32),
        in_specs=common_in_specs + [pl.BlockSpec((ro, 2), const2)],
        out_specs=pl.BlockSpec((ro, HW), row2),
        compiler_params=cparams,
    )(x2, masks, wdc, wbig, bpc, ssc)

    return out2.reshape(N, Cout, H, W)                     # pure reshape (NCHW)


def ref_forward(x, params):
    """Pure-JAX reference (no Pallas) for numerical validation."""
    wd, bd, wp, bp, gamma, beta = params
    xp = jnp.pad(x, ((0, 0), (0, 0), (1, 1), (0, 0)))
    y = (xp[:, :, :-2, :] * wd[0][None, :, None, None]
         + xp[:, :, 1:-1, :] * wd[1][None, :, None, None]
         + xp[:, :, 2:, :] * wd[2][None, :, None, None]
         + bd[None, :, None, None])
    z = jnp.einsum("nchw,cd->ndhw", y, wp,
                   precision=jax.lax.Precision.HIGHEST) + bp[None, :, None, None]
    z = jnp.tanh(z)
    mean = jnp.mean(z, axis=(0, 2, 3), keepdims=True)
    var = jnp.mean((z - mean) ** 2, axis=(0, 2, 3), keepdims=True)
    zhat = (z - mean) * jax.lax.rsqrt(var + 1e-5)
    return zhat * gamma[None, :, None, None] + beta[None, :, None, None]


def init_params(key, cin, cout):
    """Deterministic synthetic parameters (shapes match the PyTorch module)."""
    k1, k2, k3, k4 = jax.random.split(key, 4)
    # depthwise Conv2d weight (Cin, 1, 3, 1) -> stored as taps (3, Cin)
    wd = jax.random.normal(k1, (3, cin), jnp.float32) * 0.5
    bd = jax.random.normal(k2, (cin,), jnp.float32) * 0.1
    # pointwise Conv2d weight (Cout, Cin, 1, 1) -> stored transposed (Cin, Cout)
    wp = jax.random.normal(k3, (cin, cout), jnp.float32) * 0.5
    bp = jax.random.normal(k4, (cout,), jnp.float32) * 0.1
    gamma = jnp.ones((cout,), jnp.float32)   # BatchNorm2d affine init
    beta = jnp.zeros((cout,), jnp.float32)
    return (wd, bd, wp, bp, gamma, beta)


if __name__ == "__main__":
    N, Cin, H, W, Cout = 2, 4, 16, 16, 8
    key = jax.random.PRNGKey(0)
    kx, kp = jax.random.split(key)
    x = jax.random.normal(kx, (N, Cin, H, W), jnp.float32)
    params = init_params(kp, Cin, Cout)

    fwd = jax.jit(block_forward)
    out = jax.block_until_ready(fwd(x, params))
    ref = jax.block_until_ready(ref_forward(x, params))

    assert out.shape == (N, Cout, H, W)
    err = float(jnp.max(jnp.abs(out - ref)))
    assert err < 1e-4, err
    print("KERNEL_OK")
</pallas_src>

<mosaic_0001>
module attributes {stable_mosaic.version = 11 : i64} {
  func.func @stats_kernel(%arg0: i32, %arg1: memref<8x256xf32, #tpu.memory_space<vmem>>, %arg2: memref<2x256xf32, #tpu.memory_space<vmem>>, %arg3: memref<8x4xf32, #tpu.memory_space<vmem>>, %arg4: memref<16x8xf32, #tpu.memory_space<vmem>>, %arg5: memref<16x1xf32, #tpu.memory_space<vmem>>, %arg6: memref<16x2xf32, #tpu.memory_space<vmem>>) attributes {dimension_semantics = [#tpu.dimension_semantics<parallel>], iteration_bounds = array<i64: 1>, scalar_prefetch = 0 : i64, scratch_operands = 0 : i64, tpu.core_type = #tpu.core_type<tc>, window_params = [{transform_indices = @transform_0, window_bounds = array<i64: 8, 256>}, {pipeline_mode = #tpu.pipeline_mode<synchronous>, transform_indices = @transform_1, window_bounds = array<i64: 2, 256>}, {pipeline_mode = #tpu.pipeline_mode<synchronous>, transform_indices = @transform_2, window_bounds = array<i64: 8, 4>}, {pipeline_mode = #tpu.pipeline_mode<synchronous>, transform_indices = @transform_3, window_bounds = array<i64: 16, 8>}, {pipeline_mode = #tpu.pipeline_mode<synchronous>, transform_indices = @transform_4, window_bounds = array<i64: 16, 1>}, {transform_indices = @transform_5, window_bounds = array<i64: 16, 2>}]} {
    %c0 = arith.constant 0 : index
    %c0_0 = arith.constant 0 : index
    %0 = vector.load %arg1[%c0, %c0_0] : memref<8x256xf32, #tpu.memory_space<vmem>>, vector<8x256xf32>
    %c16_i32 = arith.constant 16 : i32
    %1 = tpu.dynamic_rotate %0 by %c16_i32 dim 1 : vector<8x256xf32>, i32 -> vector<8x256xf32>
    %c0_1 = arith.constant 0 : index
    %c0_2 = arith.constant 0 : index
    %2 = vector.load %arg2[%c0_1, %c0_2] : memref<2x256xf32, #tpu.memory_space<vmem>>, vector<1x256xf32>
    %3 = vector.broadcast %2 : vector<1x256xf32> to vector<8x256xf32>
    %4 = arith.mulf %1, %3 : vector<8x256xf32>
    %c240_i32 = arith.constant 240 : i32
    %5 = tpu.dynamic_rotate %0 by %c240_i32 dim 1 : vector<8x256xf32>, i32 -> vector<8x256xf32>
    %c1 = arith.constant 1 : index
    %c0_3 = arith.constant 0 : index
    %6 = vector.load %arg2[%c1, %c0_3] : memref<2x256xf32, #tpu.memory_space<vmem>>, vector<1x256xf32>
    %7 = vector.broadcast %6 : vector<1x256xf32> to vector<8x256xf32>
    %8 = arith.mulf %5, %7 : vector<8x256xf32>
    %c0_4 = arith.constant 0 : index
    %c0_5 = arith.constant 0 : index
    %9 = vector.load %arg3[%c0_4, %c0_5] : memref<8x4xf32, #tpu.memory_space<vmem>>, vector<8x1xf32>
    %10 = vector.broadcast %9 : vector<8x1xf32> to vector<8x256xf32>
    %11 = arith.mulf %4, %10 : vector<8x256xf32>
    %c0_6 = arith.constant 0 : index
    %c1_7 = arith.constant 1 : index
    %12 = vector.load %arg3[%c0_6, %c1_7] : memref<8x4xf32, #tpu.memory_space<vmem>>, vector<8x1xf32>
    %13 = vector.broadcast %12 : vector<8x1xf32> to vector<8x256xf32>
    %14 = arith.mulf %0, %13 : vector<8x256xf32>
    %15 = arith.addf %11, %14 : vector<8x256xf32>
    %c0_8 = arith.constant 0 : index
    %c2 = arith.constant 2 : index
    %16 = vector.load %arg3[%c0_8, %c2] : memref<8x4xf32, #tpu.memory_space<vmem>>, vector<8x1xf32>
    %17 = vector.broadcast %16 : vector<8x1xf32> to vector<8x256xf32>
    %18 = arith.mulf %8, %17 : vector<8x256xf32>
    %19 = arith.addf %15, %18 : vector<8x256xf32>
    %c0_9 = arith.constant 0 : index
    %c3 = arith.constant 3 : index
    %20 = vector.load %arg3[%c0_9, %c3] : memref<8x4xf32, #tpu.memory_space<vmem>>, vector<8x1xf32>
    %21 = vector.broadcast %20 : vector<8x1xf32> to vector<8x256xf32>
    %22 = arith.addf %19, %21 : vector<8x256xf32>
    %c0_10 = arith.constant 0 : index
    %c0_11 = arith.constant 0 : index
    %23 = vector.load %arg4[%c0_10, %c0_11] : memref<16x8xf32, #tpu.memory_space<vmem>>, vector<16x8xf32>
    %cst = arith.constant dense<0.000000e+00> : vector<16x256xf32>
    %24 = tpu.matmul %23, %22, %cst {dimension_numbers = #tpu.dot_dimension_numbers<[1], [0], [0], [1], [0, 0, 1, 1], [], []>} : vector<16x8xf32>, vector<8x256xf32>, vector<16x256xf32> -> vector<16x256xf32>
    %c0_12 = arith.constant 0 : index
    %c0_13 = arith.constant 0 : index
    %25 = vector.load %arg5[%c0_12, %c0_13] : memref<16x1xf32, #tpu.memory_space<vmem>>, vector<16x1xf32>
    %26 = vector.broadcast %25 : vector<16x1xf32> to vector<16x256xf32>
    %27 = arith.addf %24, %26 : vector<16x256xf32>
    %28 = math.tanh %27 : vector<16x256xf32>
    %cst_14 = arith.constant dense<0.000000e+00> : vector<16xf32>
    %29 = vector.multi_reduction <add>, %28, %cst_14 [1] : vector<16x256xf32> to vector<16xf32>
    %30 = vector.shape_cast %29 : vector<16xf32> to vector<16x1xf32>
    %c0_15 = arith.constant 0 : index
    %c0_16 = arith.constant 0 : index
    %31 = vector.load %arg6[%c0_15, %c0_16] : memref<16x2xf32, #tpu.memory_space<vmem>>, vector<16x1xf32>
    tpu.vector_store %arg6[%c0_15, %c0_16], %30 {strides = array<i32>} : memref<16x2xf32, #tpu.memory_space<vmem>>, vector<16x1xf32>,
    %32 = arith.mulf %28, %28 : vector<16x256xf32>
    %cst_17 = arith.constant dense<0.000000e+00> : vector<16xf32>
    %33 = vector.multi_reduction <add>, %32, %cst_17 [1] : vector<16x256xf32> to vector<16xf32>
    %34 = vector.shape_cast %33 : vector<16xf32> to vector<16x1xf32>
    %c0_18 = arith.constant 0 : index
    %c1_19 = arith.constant 1 : index
    %35 = vector.load %arg6[%c0_18, %c1_19] : memref<16x2xf32, #tpu.memory_space<vmem>>, vector<16x1xf32>
    tpu.vector_store %arg6[%c0_18, %c1_19], %34 {strides = array<i32>} : memref<16x2xf32, #tpu.memory_space<vmem>>, vector<16x1xf32>,
    return
  }
  func.func @transform_0(%arg0: i32) -> (i32, i32) {
    %c0_i32 = arith.constant 0 : i32
    %c0_i32_0 = arith.constant 0 : i32
    return %arg0, %c0_i32 : i32, i32
  }
  func.func @transform_1(%arg0: i32) -> (i32, i32) {
    %c0_i32 = arith.constant 0 : i32
    %c0_i32_0 = arith.constant 0 : i32
    %c0_i32_1 = arith.constant 0 : i32
    return %c0_i32, %c0_i32_0 : i32, i32
  }
  func.func @transform_2(%arg0: i32) -> (i32, i32) {
    %c0_i32 = arith.constant 0 : i32
    %c0_i32_0 = arith.constant 0 : i32
    %c0_i32_1 = arith.constant 0 : i32
    return %c0_i32, %c0_i32_0 : i32, i32
  }
  func.func @transform_3(%arg0: i32) -> (i32, i32) {
    %c0_i32 = arith.constant 0 : i32
    %c0_i32_0 = arith.constant 0 : i32
    %c0_i32_1 = arith.constant 0 : i32
    return %c0_i32, %c0_i32_0 : i32, i32
  }
  func.func @transform_4(%arg0: i32) -> (i32, i32) {
    %c0_i32 = arith.constant 0 : i32
    %c0_i32_0 = arith.constant 0 : i32
    %c0_i32_1 = arith.constant 0 : i32
    return %c0_i32, %c0_i32_0 : i32, i32
  }
  func.func @transform_5(%arg0: i32) -> (i32, i32) {
    %c0_i32 = arith.constant 0 : i32
    %c0_i32_0 = arith.constant 0 : i32
    return %arg0, %c0_i32 : i32, i32
  }
}

module attributes {stable_mosaic.version = 11 : i64} {
  func.func @out_kernel(%arg0: i32, %arg1: memref<8x256xf32, #tpu.memory_space<vmem>>, %arg2: memref<2x256xf32, #tpu.memory_space<vmem>>, %arg3: memref<8x4xf32, #tpu.memory_space<vmem>>, %arg4: memref<16x8xf32, #tpu.memory_space<vmem>>, %arg5: memref<16x1xf32, #tpu.memory_space<vmem>>, %arg6: memref<16x2xf32, #tpu.memory_space<vmem>>, %arg7: memref<16x256xf32, #tpu.memory_space<vmem>>) attributes {dimension_semantics = [#tpu.dimension_semantics<parallel>], iteration_bounds = array<i64: 1>, scalar_prefetch = 0 : i64, scratch_operands = 0 : i64, tpu.core_type = #tpu.core_type<tc>, window_params = [{transform_indices = @transform_0, window_bounds = array<i64: 8, 256>}, {pipeline_mode = #tpu.pipeline_mode<synchronous>, transform_indices = @transform_1, window_bounds = array<i64: 2, 256>}, {pipeline_mode = #tpu.pipeline_mode<synchronous>, transform_indices = @transform_2, window_bounds = array<i64: 8, 4>}, {pipeline_mode = #tpu.pipeline_mode<synchronous>, transform_indices = @transform_3, window_bounds = array<i64: 16, 8>}, {pipeline_mode = #tpu.pipeline_mode<synchronous>, transform_indices = @transform_4, window_bounds = array<i64: 16, 1>}, {pipeline_mode = #tpu.pipeline_mode<synchronous>, transform_indices = @transform_5, window_bounds = array<i64: 16, 2>}, {transform_indices = @transform_6, window_bounds = array<i64: 16, 256>}]} {
    %c0 = arith.constant 0 : index
    %c0_0 = arith.constant 0 : index
    %0 = vector.load %arg1[%c0, %c0_0] : memref<8x256xf32, #tpu.memory_space<vmem>>, vector<8x256xf32>
    %c16_i32 = arith.constant 16 : i32
    %1 = tpu.dynamic_rotate %0 by %c16_i32 dim 1 : vector<8x256xf32>, i32 -> vector<8x256xf32>
    %c0_1 = arith.constant 0 : index
    %c0_2 = arith.constant 0 : index
    %2 = vector.load %arg2[%c0_1, %c0_2] : memref<2x256xf32, #tpu.memory_space<vmem>>, vector<1x256xf32>
    %3 = vector.broadcast %2 : vector<1x256xf32> to vector<8x256xf32>
    %4 = arith.mulf %1, %3 : vector<8x256xf32>
    %c240_i32 = arith.constant 240 : i32
    %5 = tpu.dynamic_rotate %0 by %c240_i32 dim 1 : vector<8x256xf32>, i32 -> vector<8x256xf32>
    %c1 = arith.constant 1 : index
    %c0_3 = arith.constant 0 : index
    %6 = vector.load %arg2[%c1, %c0_3] : memref<2x256xf32, #tpu.memory_space<vmem>>, vector<1x256xf32>
    %7 = vector.broadcast %6 : vector<1x256xf32> to vector<8x256xf32>
    %8 = arith.mulf %5, %7 : vector<8x256xf32>
    %c0_4 = arith.constant 0 : index
    %c0_5 = arith.constant 0 : index
    %9 = vector.load %arg3[%c0_4, %c0_5] : memref<8x4xf32, #tpu.memory_space<vmem>>, vector<8x1xf32>
    %10 = vector.broadcast %9 : vector<8x1xf32> to vector<8x256xf32>
    %11 = arith.mulf %4, %10 : vector<8x256xf32>
    %c0_6 = arith.constant 0 : index
    %c1_7 = arith.constant 1 : index
    %12 = vector.load %arg3[%c0_6, %c1_7] : memref<8x4xf32, #tpu.memory_space<vmem>>, vector<8x1xf32>
    %13 = vector.broadcast %12 : vector<8x1xf32> to vector<8x256xf32>
    %14 = arith.mulf %0, %13 : vector<8x256xf32>
    %15 = arith.addf %11, %14 : vector<8x256xf32>
    %c0_8 = arith.constant 0 : index
    %c2 = arith.constant 2 : index
    %16 = vector.load %arg3[%c0_8, %c2] : memref<8x4xf32, #tpu.memory_space<vmem>>, vector<8x1xf32>
    %17 = vector.broadcast %16 : vector<8x1xf32> to vector<8x256xf32>
    %18 = arith.mulf %8, %17 : vector<8x256xf32>
    %19 = arith.addf %15, %18 : vector<8x256xf32>
    %c0_9 = arith.constant 0 : index
    %c3 = arith.constant 3 : index
    %20 = vector.load %arg3[%c0_9, %c3] : memref<8x4xf32, #tpu.memory_space<vmem>>, vector<8x1xf32>
    %21 = vector.broadcast %20 : vector<8x1xf32> to vector<8x256xf32>
    %22 = arith.addf %19, %21 : vector<8x256xf32>
    %c0_10 = arith.constant 0 : index
    %c0_11 = arith.constant 0 : index
    %23 = vector.load %arg4[%c0_10, %c0_11] : memref<16x8xf32, #tpu.memory_space<vmem>>, vector<16x8xf32>
    %cst = arith.constant dense<0.000000e+00> : vector<16x256xf32>
    %24 = tpu.matmul %23, %22, %cst {dimension_numbers = #tpu.dot_dimension_numbers<[1], [0], [0], [1], [0, 0, 1, 1], [], []>} : vector<16x8xf32>, vector<8x256xf32>, vector<16x256xf32> -> vector<16x256xf32>
    %c0_12 = arith.constant 0 : index
    %c0_13 = arith.constant 0 : index
    %25 = vector.load %arg5[%c0_12, %c0_13] : memref<16x1xf32, #tpu.memory_space<vmem>>, vector<16x1xf32>
    %26 = vector.broadcast %25 : vector<16x1xf32> to vector<16x256xf32>
    %27 = arith.addf %24, %26 : vector<16x256xf32>
    %28 = math.tanh %27 : vector<16x256xf32>
    %c0_14 = arith.constant 0 : index
    %c0_15 = arith.constant 0 : index
    %29 = vector.load %arg6[%c0_14, %c0_15] : memref<16x2xf32, #tpu.memory_space<vmem>>, vector<16x1xf32>
    %30 = vector.broadcast %29 : vector<16x1xf32> to vector<16x256xf32>
    %31 = arith.mulf %28, %30 : vector<16x256xf32>
    %c0_16 = arith.constant 0 : index
    %c1_17 = arith.constant 1 : index
    %32 = vector.load %arg6[%c0_16, %c1_17] : memref<16x2xf32, #tpu.memory_space<vmem>>, vector<16x1xf32>
    %33 = vector.broadcast %32 : vector<16x1xf32> to vector<16x256xf32>
    %34 = arith.addf %31, %33 : vector<16x256xf32>
    %c0_18 = arith.constant 0 : index
    %c0_19 = arith.constant 0 : index
    %35 = vector.load %arg7[%c0_18, %c0_19] : memref<16x256xf32, #tpu.memory_space<vmem>>, vector<16x256xf32>
    tpu.vector_store %arg7[%c0_18, %c0_19], %34 {strides = array<i32>} : memref<16x256xf32, #tpu.memory_space<vmem>>, vector<16x256xf32>,
    return
  }
  func.func @transform_0(%arg0: i32) -> (i32, i32) {
    %c0_i32 = arith.constant 0 : i32
    %c0_i32_0 = arith.constant 0 : i32
    return %arg0, %c0_i32 : i32, i32
  }
  func.func @transform_1(%arg0: i32) -> (i32, i32) {
    %c0_i32 = arith.constant 0 : i32
    %c0_i32_0 = arith.constant 0 : i32
    %c0_i32_1 = arith.constant 0 : i32
    return %c0_i32, %c0_i32_0 : i32, i32
  }
  func.func @transform_2(%arg0: i32) -> (i32, i32) {
    %c0_i32 = arith.constant 0 : i32
    %c0_i32_0 = arith.constant 0 : i32
    %c0_i32_1 = arith.constant 0 : i32
    return %c0_i32, %c0_i32_0 : i32, i32
  }
  func.func @transform_3(%arg0: i32) -> (i32, i32) {
    %c0_i32 = arith.constant 0 : i32
    %c0_i32_0 = arith.constant 0 : i32
    %c0_i32_1 = arith.constant 0 : i32
    return %c0_i32, %c0_i32_0 : i32, i32
  }
  func.func @transform_4(%arg0: i32) -> (i32, i32) {
    %c0_i32 = arith.constant 0 : i32
    %c0_i32_0 = arith.constant 0 : i32
    %c0_i32_1 = arith.constant 0 : i32
    return %c0_i32, %c0_i32_0 : i32, i32
  }
  func.func @transform_5(%arg0: i32) -> (i32, i32) {
    %c0_i32 = arith.constant 0 : i32
    %c0_i32_0 = arith.constant 0 : i32
    %c0_i32_1 = arith.constant 0 : i32
    return %c0_i32, %c0_i32_0 : i32, i32
  }
  func.func @transform_6(%arg0: i32) -> (i32, i32) {
    %c0_i32 = arith.constant 0 : i32
    %c0_i32_0 = arith.constant 0 : i32
    return %arg0, %c0_i32 : i32, i32
  }
}

</mosaic_0001>

<bundles_post_ra>
// kernel: tile.44
= control target key start
LH: loop header
LB: loop body
LE: loop exit
PB: predicated region body
PF: predicated region fallthrough
CT: control target
= control target key end

     0   :  { %s22_s0 = inlined_call_operand.vmem [shape: f32[4], index: 0, kind: input, shape index: {}]   ;;  %s23_s1 = inlined_call_operand.vmem [shape: f32[2,4], index: 1, kind: output, shape index: {}]  }
   0x1   :  { %v4_v0 = vld [vmem:[%s22_s0] ss:$0 sm:$0xff] }
   0x2   :  { %5 = vst [vmem:[%s23_s1] sm:$0x3] %v4_v0 }

// kernel: tile.52
= control target key start
LH: loop header
LB: loop body
LE: loop exit
PB: predicated region body
PF: predicated region fallthrough
CT: control target
= control target key end

     0   :  { %s22_s0 = inlined_call_operand.vmem [shape: f32[8], index: 0, kind: input, shape index: {}]   ;;  %s23_s1 = inlined_call_operand.vmem [shape: f32[2,8], index: 1, kind: output, shape index: {}]  }
   0x1   :  { %v4_v0 = vld [vmem:[%s22_s0] ss:$0 sm:$0xff] }
   0x2   :  { %5 = vst [vmem:[%s23_s1] sm:$0x3] %v4_v0 }

// kernel: tile.1
= control target key start
LH: loop header
LB: loop body
LE: loop exit
PB: predicated region body
PF: predicated region fallthrough
CT: control target
= control target key end

     0   :  { %s34_s8 = smov 125   ;;  %vm7_vm0 = vcmask 7168   ;;  %s35_s11 = smov 126   ;;  %s61_s0 = inlined_call_operand.vmem [shape: f32[2,4], index: 0, kind: input, shape index: {}]   ;;  %s62_s1 = inlined_call_operand.vmem [shape: f32[8,1], index: 1, kind: output, shape index: {}]  }
   0x1   :  { %v4_v0 = vld [vmem:[%s61_s0] sm:$0x3]  ;;  %s33_s0 = smov 127  }
   0x2   :  { %5 = vst [vmem:[#allocation0] sm:$0x3] %v4_v0 }
   0x9   :  { %v9_v1 = vld [vmem:[#allocation0] sm:$0x3]  }
   0xa   :  { %v21_v2 = vld [vmem:[#allocation0] sm:$0x3]   ;;  %10 = vrot.lane.b32.xlu0 %v9_v1, %s33_s0 }
   0xb   :  { %22 = vrot.lane.b32.xlu1 %v21_v2, %s34_s8  ;;  %v6_v3 = vld [vmem:[#allocation0] sm:$0x3]  }
   0xc   :  { %v15_v4 = vld [vmem:[#allocation0] sm:$0x3]   ;;  %8 = vst.msk [vmem:[%s62_s1] ss:$4 sm:$0x3] %vm7_vm0, %v6_v3  }
   0xe   :  { %16 = vrot.lane.b32.xlu0 %v15_v4, %s35_s11 }
  0x7c   :  { %v11_v5 = vpop.permute.xlu0 %10  }
  0x7d   :  { %v23_v6 = vpop.permute.xlu1 %22   ;;  %27 = vst.msk [vmem:[%s62_s1 + $0x1] ss:$4 sm:$0x3] %vm7_vm0, %v11_v5  }
  0x7e   :  { %29 = vst.msk [vmem:[%s62_s1 + $0x3] ss:$4 sm:$0x3] %vm7_vm0, %v23_v6  }
  0x80   :  { %v17_v7 = vpop.permute.xlu0 %16  }
  0x81   :  { %28 = vst.msk [vmem:[%s62_s1 + $0x2] ss:$4 sm:$0x3] %vm7_vm0, %v17_v7  }

// kernel: tile.4
= control target key start
LH: loop header
LB: loop body
LE: loop exit
PB: predicated region body
PF: predicated region fallthrough
CT: control target
= control target key end

     0   :  { %s66_s8 = smov 125   ;;  %vm7_vm0 = vcmask 7168   ;;  %s67_s11 = smov 126   ;;  %s117_s0 = inlined_call_operand.vmem [shape: f32[2,8], index: 0, kind: input, shape index: {}]   ;;  %s118_s1 = inlined_call_operand.vmem [shape: f32[16,1], index: 1, kind: output, shape index: {}]  }
   0x1   :  { %v4_v0 = vld [vmem:[%s117_s0] sm:$0x3]  ;;  %s65_s0 = smov 127   ;;  %s68_s12 = smov 124  }
   0x2   :  { %5 = vst [vmem:[#allocation0] sm:$0x3] %v4_v0  ;;  %s69_s13 = smov 123   ;;  %s70_s14 = smov 122  }
   0x3   :  { %s71_s15 = smov 121  }
   0x9   :  { %v9_v1 = vld [vmem:[#allocation0] sm:$0x3]  }
   0xa   :  { %v21_v2 = vld [vmem:[#allocation0] sm:$0x3]   ;;  %10 = vrot.lane.b32.xlu0 %v9_v1, %s65_s0 }
   0xb   :  { %22 = vrot.lane.b32.xlu1 %v21_v2, %s66_s8  ;;  %v15_v3 = vld [vmem:[#allocation0] sm:$0x3]  }
   0xc   :  { %v27_v4 = vld [vmem:[#allocation0] sm:$0x3]  }
   0xd   :  { %v6_v5 = vld [vmem:[#allocation0] sm:$0x3]  }
   0xe   :  { %8 = vst.msk [vmem:[%s118_s1] ss:$8 sm:$0x3] %vm7_vm0, %v6_v5   ;;  %16 = vrot.lane.b32.xlu0 %v15_v3, %s67_s11  ;;  %v33_v6 = vld [vmem:[#allocation0] sm:$0x3]  }
   0xf   :  { %28 = vrot.lane.b32.xlu1 %v27_v4, %s68_s12  ;;  %v39_v7 = vld [vmem:[#allocation0] sm:$0x3]  }
  0x10   :  { %v45_v8 = vld [vmem:[#allocation0] sm:$0x3]  }
  0x12   :  { %34 = vrot.lane.b32.xlu0 %v33_v6, %s69_s13 }
  0x13   :  { %40 = vrot.lane.b32.xlu1 %v39_v7, %s70_s14 }
  0x16   :  { %46 = vrot.lane.b32.xlu0 %v45_v8, %s71_s15 }
  0x7c   :  { %v11_v9 = vpop.permute.xlu0 %10  }
  0x7d   :  { %v23_v10 = vpop.permute.xlu1 %22   ;;  %51 = vst.msk [vmem:[%s118_s1 + $0x1] ss:$8 sm:$0x3] %vm7_vm0, %v11_v9  }
  0x7e   :  { %53 = vst.msk [vmem:[%s118_s1 + $0x3] ss:$8 sm:$0x3] %vm7_vm0, %v23_v10  }
  0x80   :  { %v17_v11 = vpop.permute.xlu0 %16  }
  0x81   :  { %v29_v12 = vpop.permute.xlu1 %28   ;;  %52 = vst.msk [vmem:[%s118_s1 + $0x2] ss:$8 sm:$0x3] %vm7_vm0, %v17_v11  }
  0x82   :  { %54 = vst.msk [vmem:[%s118_s1 + $0x4] ss:$8 sm:$0x3] %vm7_vm0, %v29_v12  }
  0x84   :  { %v35_v13 = vpop.permute.xlu0 %34  }
  0x85   :  { %v41_v14 = vpop.permute.xlu1 %40   ;;  %55 = vst.msk [vmem:[%s118_s1 + $0x5] ss:$8 sm:$0x3] %vm7_vm0, %v35_v13  }
  0x86   :  { %56 = vst.msk [vmem:[%s118_s1 + $0x6] ss:$8 sm:$0x3] %vm7_vm0, %v41_v14  }
  0x88   :  { %v47_v15 = vpop.permute.xlu0 %46  }
  0x89   :  { %57 = vst.msk [vmem:[%s118_s1 + $0x7] ss:$8 sm:$0x3] %vm7_vm0, %v47_v15  }

// kernel: tile.63
= control target key start
LH: loop header
LB: loop body
LE: loop exit
PB: predicated region body
PF: predicated region fallthrough
CT: control target
= control target key end

     0   :  { %vm7_vm0 = vcmask 64512   ;;  %vm13_vm1 = vcmask 130112   ;;  %s39_s0 = inlined_call_operand.vmem [shape: f32[2,8], index: 0, kind: input, shape index: {}]   ;;  %s40_s1 = inlined_call_operand.vmem [shape: f32[16,1], index: 1, kind: output, shape index: {}]  }
   0x1   :  { %v4_v0 = vld [vmem:[%s39_s0] sm:$0x3]  ;;  %s22_s0 = smov 8  }
   0x2   :  { %5 = vst [vmem:[#allocation1] sm:$0x3] %v4_v0 }
   0x9   :  { %v10_v1 = vld [vmem:[#allocation1 + $0x1] sm:$0x1]   ;;  %v6_v2 = vld [vmem:[#allocation1] sm:$0x1]  }
   0xa   :  { %11 = vrot.lane.b32.xlu0 %v10_v1, %s22_s0  ;;  %8 = vst.msk [vmem:[#allocation0] sm:$0x1] %vm7_vm0, %v6_v2  }
  0x7c   :  { %v12_v3 = vpop.permute.xlu0 %11  }
  0x7d   :  { %14 = vst.msk [vmem:[#allocation0] sm:$0x1] %vm13_vm1, %v12_v3  }
  0x84   :  { %v18_v4 = vld [vmem:[#allocation0] sm:$0x1] }
  0x85   :  { %20 = vst [vmem:[%s40_s1] sm:$0x1] %v18_v4 }

// kernel: block_forward.3
= control target key start
LH: loop header
LB: loop body
LE: loop exit
PB: predicated region body
PF: predicated region fallthrough
CT: control target
= control target key end

     0   :  { %v266_v0 = vmov 2   ;;  %v267_v1 = vmov 0   ;;  %v268_v4 = vmov 1   ;;  %s269_s25 = smov 16   ;;  %v271_v6 = vmov 3   ;;  %s358_s2 = inlined_call_operand.vmem [shape: f32[8,4], index: 2, kind: input, shape index: {}]   ;;  %s359_s0 = inlined_call_operand.vmem [shape: f32[8,256], index: 0, kind: input, shape index: {}]   ;;  %s360_s4 = inlined_call_operand.vmem [shape: f32[16,1], index: 4, kind: input, shape index: {}]   ;;  %s361_s5 = inlined_call_operand.vmem [shape: f32[16,2], index: 5, kind: input, shape index: {}]   ;;  %s362_s1 = inlined_call_operand.vmem [shape: f32[2,256], index: 1, kind: input, shape index: {}]   ;;  %s363_s3 = inlined_call_operand.vmem [shape: f32[16,8], index: 3, kind: input, shape index: {}]   ;;  %s364_s6 = inlined_call_operand.vmem [shape: f32[16,256], index: 6, kind: output, shape index: {}]  }
   0x1   :  { %252 = vset.pattern.permute.xlu1 %v266_v0  ;;  %250 = vset.pattern.permute.xlu0 %v267_v1  ;;  %v70_v2 = vld [vmem:[%s358_s2] sm:$0xff]  ;;  %v24_v5 = vld [vmem:[%s359_s0 + $0x8] sm:$0xff]  ;;  %s270_s2 = smov 112   ;;  %v272_v7 = vmov 0.0   ;;  %v29_v12 = vlaneseq  ;;  %vm114_vm2 = vcmask 64512  }
   0x2   :  { %87 = vperm.xlu1 %252, %v70_v2   ;;  %73 = vperm.xlu0 %250, %v70_v2   ;;  %v314_v3 = vld [vmem:[%s359_s0] sm:$0xff]  ;;  %v103_v10 = vld [vmem:[%s360_s4 + $0x8] sm:$0xff] }
   0x3   :  { %185 = vmatprep.mubr.f32.mxu0 %v272_v7  ;;  %191 = vmatprep.mubr.f32.mxu1 %v272_v7  ;;  %v102_v8 = vld [vmem:[%s360_s4] sm:$0xff]  ;;  %v203_v11 = vld [vmem:[%s361_s5 + $0x8] sm:$0xff]  ;;  %v37_v13 = vshrl.u32 %v29_v12, 7  ;;  %v30_v16 = vand.u32 127, %v29_v12 }
   0x4   :  { %v202_v9 = vld [vmem:[%s361_s5] sm:$0xff]  ;;  %v101_v52 = vld [vmem:[%s363_s3 + $0x8] sm:$0xff] }
   0x5   :  { %v38_v17 = vsub.s32 0, %v37_v13  ;;  %v42_v18 = vsub.s32 1, %v37_v13  ;;  %v34_v19 = vld [vmem:[%s362_s1] ss:$2 sm:$0x3]  ;;  %vm31_vm0 = vcmp.lt.s32.totalorder %v30_v16, 16 }
   0x6   :  { %251 = vset.pattern.permute.xlu0 %v268_v4  ;;  %25 = vrot.lane.b32.xlu1 %v314_v3, %s269_s25  ;;  %v238_v24 = vld [vmem:[%s362_s1 + $0x1] ss:$2 sm:$0x3]  ;;  %vm52_vm1 = vcmp.lt.s32.totalorder %v30_v16, 112 }
   0x7   :  { %79 = vperm.xlu0 %251, %v70_v2   ;;  %254 = vset.pattern.permute.xlu1 %v267_v1  ;;  %v39_v22 = vrot.slane %v34_v19, %v38_v17  ;;  %v43_v23 = vrot.slane %v34_v19, %v42_v18  ;;  %v61_v30 = vrot.slane %v238_v24, %v38_v17  ;;  %v100_v51 = vld [vmem:[%s363_s3] sm:$0xff] }
   0x8   :  { %v65_v31 = vrot.slane %v238_v24, %v42_v18 }
   0xa   :  { %27 = vrot.lane.b32.xlu1 %v24_v5, %s269_s25 }
   0xb   :  { %48 = vrot.lane.b32.xlu0 %v314_v3, %s270_s2 }
   0xc   :  { %253 = vset.pattern.permute.xlu0 %v271_v6 }
   0xe   :  { %50 = vrot.lane.b32.xlu1 %v24_v5, %s270_s2 }
   0xf   :  { %95 = vperm.xlu0 %253, %v70_v2  }
  0x12   :  { %106 = vperm.xlu1 %254, %v102_v8  }
  0x13   :  { %255 = vset.pattern.permute.xlu0 %v267_v1 }
  0x14   :  { %206 = vperm.xlu0 %255, %v202_v9  }
  0x16   :  { %111 = vperm.xlu1 %254, %v103_v10  }
  0x18   :  { %257 = vset.pattern.permute.xlu0 %v268_v4 }
  0x19   :  { %223 = vperm.xlu0 %257, %v203_v11  }
  0x1a   :  { %211 = vperm.xlu1 %254, %v203_v11  }
  0x1e   :  { %256 = vset.pattern.permute.xlu1 %v268_v4 }
  0x1f   :  { %219 = vperm.xlu1 %256, %v202_v9  }
  0x81   :  { %v88_v14 = vpop.permute.xlu1 %87  ;;  %v74_v15 = vpop.permute.xlu0 %73 }
  0x85   :  { %v26_v20 = vpop.permute.xlu1 %25 }
  0x86   :  { %v80_v21 = vpop.permute.xlu0 %79 }
  0x87   :  { %v82_v38 = vmul.f32 %v80_v21, %v314_v3  ;;  %v83_v39 = vmul.f32 %v80_v21, %v24_v5 }
  0x89   :  { %v28_v25 = vpop.permute.xlu1 %27 }
  0x8a   :  { %v32_v26 = vsel %vm31_vm0, %v26_v20, %v28_v25  ;;  %v33_v27 = vsel %vm31_vm0, %v28_v25, %v26_v20  ;;  %v49_v34 = vpop.permute.xlu0 %48 }
  0x8b   :  { %v46_v28 = vmul.f32 %v39_v22, %v33_v27  ;;  %v47_v29 = vmul.f32 %v43_v23, %v32_v26 }
  0x8d   :  { %v76_v32 = vmul.f32 %v74_v15, %v46_v28  ;;  %v77_v33 = vmul.f32 %v74_v15, %v47_v29  ;;  %v51_v35 = vpop.permute.xlu1 %50 }
  0x8e   :  { %v53_v36 = vsel %vm52_vm1, %v49_v34, %v51_v35  ;;  %v54_v37 = vsel %vm52_vm1, %v51_v35, %v49_v34  ;;  %v96_v46 = vpop.permute.xlu0 %95 }
  0x8f   :  { %v68_v40 = vmul.f32 %v61_v30, %v53_v36  ;;  %v69_v41 = vmul.f32 %v65_v31, %v54_v37  ;;  %v85_v44 = vadd.f32 %v83_v39, %v77_v33  ;;  %v84_v45 = vadd.f32 %v82_v38, %v76_v32 }
  0x91   :  { %v90_v42 = vmul.f32 %v88_v14, %v68_v40  ;;  %v91_v43 = vmul.f32 %v88_v14, %v69_v41  ;;  %v107_v53 = vpop.permute.xlu1 %106 }
  0x93   :  { %v93_v47 = vadd.f32 %v91_v43, %v85_v44  ;;  %v92_v48 = vadd.f32 %v90_v42, %v84_v45  ;;  %v207_v63 = vpop.permute.xlu0 %206 }
  0x95   :  { %v99_v49 = vadd.f32 %v96_v46, %v93_v47  ;;  %v98_v50 = vadd.f32 %v96_v46, %v92_v48  ;;  %v112_v54 = vpop.permute.xlu1 %111 }
  0x97   :  { %121 = vmatprep.subr.mxu0 %v99_v49  ;;  %241 = vmatprep.subr.mxu1 %v99_v49 }
  0x98   :  { %122 = vmatpush1.msra.mxu0 %v98_v50  ;;  %242 = vmatpush1.msra.mxu1 %v98_v50  ;;  %v224_v5 = vpop.permute.xlu0 %223 }
  0x99   :  { %239 = vmatmul.mubr.msk.f32.vlgmr.msra.gmra.mrb[0].mxu0 %vm114_vm2, %v100_v51  ;;  %240 = vmatmul.mubr.msk.f32.vlgmr.msra.gmra.mrb[0].mxu1 %vm114_vm2, %v101_v52  ;;  %v212_v0 = vpop.permute.xlu1 %211 }
  0x9e   :  { %v220_v2 = vpop.permute.xlu1 %219 }
 0x16c   :  { %v187_v55 = vpop.f32.mrb[0].mxu0  ;;  %v193_v56 = vpop.f32.mrb[0].mxu1 }
 0x16d   :  { %v188_v57 = vadd.f32 %v187_v55, %v107_v53  ;;  %v194_v58 = vadd.f32 %v193_v56, %v112_v54  ;;  %v189_v59 = vpop.f32.mrb[1].mxu0  ;;  %v195_v60 = vpop.f32.mrb[1].mxu1 }
 0x16e   :  { %v190_v61 = vadd.f32 %v189_v59, %v107_v53  ;;  %v196_v62 = vadd.f32 %v195_v60, %v112_v54 }
 0x16f   :  { %258 = vtanh.f32 %v188_v57 }
 0x170   :  { %260 = vtanh.f32 %v194_v58 }
 0x171   :  { %262 = vtanh.f32 %v190_v61 }
 0x172   :  { %264 = vtanh.f32 %v196_v62 }
 0x179   :  { %v259_v1 = vpop.eup %258 }
 0x17a   :  { %v261_v3 = vpop.eup %260  ;;  %v214_v4 = vmul.f32 %v259_v1, %v207_v63 }
 0x17b   :  { %v263_v6 = vpop.eup %262  ;;  %v216_v7 = vmul.f32 %v261_v3, %v212_v0 }
 0x17c   :  { %v265_v8 = vpop.eup %264  ;;  %v215_v9 = vmul.f32 %v263_v6, %v207_v63  ;;  %v226_v10 = vadd.f32 %v220_v2, %v214_v4 }
 0x17d   :  { %v217_v11 = vmul.f32 %v265_v8, %v212_v0  ;;  %v228_v12 = vadd.f32 %v224_v5, %v216_v7 }
 0x17e   :  { %v227_v13 = vadd.f32 %v220_v2, %v215_v9  ;;  %230 = vst [vmem:[%s364_s6] sm:$0xff] %v226_v10 }
 0x17f   :  { %v229_v14 = vadd.f32 %v224_v5, %v217_v11  ;;  %232 = vst [vmem:[%s364_s6 + $0x10] sm:$0xff] %v228_v12 }
 0x180   :  { %231 = vst [vmem:[%s364_s6 + $0x8] sm:$0xff] %v227_v13 }
 0x181   :  { %233 = vst [vmem:[%s364_s6 + $0x18] sm:$0xff] %v229_v14 }

// kernel: block_forward.2
= control target key start
LH: loop header
LB: loop body
LE: loop exit
PB: predicated region body
PF: predicated region fallthrough
CT: control target
= control target key end

     0   :  { %v251_v0 = vmov 2   ;;  %v252_v1 = vmov 0   ;;  %v253_v4 = vmov 1   ;;  %s254_s22 = smov 16   ;;  %s255_s25 = smov 112   ;;  %v256_v6 = vmov 3   ;;  %s327_s2 = inlined_call_operand.vmem [shape: f32[8,4], index: 2, kind: input, shape index: {}]   ;;  %s328_s0 = inlined_call_operand.vmem [shape: f32[8,256], index: 0, kind: input, shape index: {}]   ;;  %s329_s4 = inlined_call_operand.vmem [shape: f32[16,1], index: 4, kind: input, shape index: {}]   ;;  %s330_s1 = inlined_call_operand.vmem [shape: f32[2,256], index: 1, kind: input, shape index: {}]   ;;  %s331_s3 = inlined_call_operand.vmem [shape: f32[16,8], index: 3, kind: input, shape index: {}]   ;;  %s332_s5 = inlined_call_operand.vmem [shape: f32[16,2], index: 5, kind: output, shape index: {}]  }
   0x1   :  { %239 = vset.pattern.permute.xlu1 %v251_v0  ;;  %237 = vset.pattern.permute.xlu0 %v252_v1  ;;  %v67_v2 = vld [vmem:[%s327_s2] sm:$0xff]  ;;  %v21_v5 = vld [vmem:[%s328_s0 + $0x8] sm:$0xff]  ;;  %v257_v7 = vmov 0.0   ;;  %v26_v10 = vlaneseq  ;;  %vm111_vm2 = vcmask 64512   ;;  %vm205_vm3 = vcmask 7168  }
   0x2   :  { %84 = vperm.xlu1 %239, %v67_v2   ;;  %70 = vperm.xlu0 %237, %v67_v2   ;;  %v20_v3 = vld [vmem:[%s328_s0] sm:$0xff]  ;;  %v100_v9 = vld [vmem:[%s329_s4 + $0x8] sm:$0xff]  ;;  %vm218_vm4 = vcmask 15368  }
   0x3   :  { %182 = vmatprep.mubr.f32.mxu0 %v257_v7  ;;  %188 = vmatprep.mubr.f32.mxu1 %v257_v7  ;;  %v99_v8 = vld [vmem:[%s329_s4] sm:$0xff]  ;;  %v34_v11 = vshrl.u32 %v26_v10, 7  ;;  %v27_v14 = vand.u32 127, %v26_v10  ;;  %v98_v50 = vld [vmem:[%s331_s3 + $0x8] sm:$0xff] }
   0x4   :  { %v31_v17 = vld [vmem:[%s330_s1] ss:$2 sm:$0x3]  ;;  %v225_v22 = vld [vmem:[%s330_s1 + $0x1] ss:$2 sm:$0x3] }
   0x5   :  { %v35_v15 = vsub.s32 0, %v34_v11  ;;  %v39_v16 = vsub.s32 1, %v34_v11  ;;  %vm28_vm0 = vcmp.lt.s32.totalorder %v27_v14, 16  ;;  %vm49_vm1 = vcmp.lt.s32.totalorder %v27_v14, 112  ;;  %v97_v49 = vld [vmem:[%s331_s3] sm:$0xff] }
   0x6   :  { %238 = vset.pattern.permute.xlu0 %v253_v4  ;;  %22 = vrot.lane.b32.xlu1 %v20_v3, %s254_s22 }
   0x7   :  { %76 = vperm.xlu0 %238, %v67_v2   ;;  %241 = vset.pattern.permute.xlu1 %v252_v1  ;;  %v36_v20 = vrot.slane %v31_v17, %v35_v15  ;;  %v40_v21 = vrot.slane %v31_v17, %v39_v16  ;;  %v58_v28 = vrot.slane %v225_v22, %v35_v15 }
   0x8   :  { %v62_v29 = vrot.slane %v225_v22, %v39_v16 }
   0xa   :  { %24 = vrot.lane.b32.xlu1 %v21_v5, %s254_s22 }
   0xb   :  { %45 = vrot.lane.b32.xlu0 %v20_v3, %s255_s25 }
   0xc   :  { %240 = vset.pattern.permute.xlu0 %v256_v6 }
   0xe   :  { %47 = vrot.lane.b32.xlu1 %v21_v5, %s255_s25 }
   0xf   :  { %92 = vperm.xlu0 %240, %v67_v2  }
  0x12   :  { %103 = vperm.xlu1 %241, %v99_v8  }
  0x13   :  { %242 = vset.pattern.permute.xlu0 %v252_v1 }
  0x16   :  { %108 = vperm.xlu1 %241, %v100_v9  }
  0x81   :  { %v85_v12 = vpop.permute.xlu1 %84  ;;  %v71_v13 = vpop.permute.xlu0 %70 }
  0x85   :  { %v23_v18 = vpop.permute.xlu1 %22 }
  0x86   :  { %v77_v19 = vpop.permute.xlu0 %76 }
  0x87   :  { %v79_v36 = vmul.f32 %v77_v19, %v20_v3  ;;  %v80_v37 = vmul.f32 %v77_v19, %v21_v5 }
  0x89   :  { %v25_v23 = vpop.permute.xlu1 %24 }
  0x8a   :  { %v29_v24 = vsel %vm28_vm0, %v23_v18, %v25_v23  ;;  %v30_v25 = vsel %vm28_vm0, %v25_v23, %v23_v18  ;;  %v46_v32 = vpop.permute.xlu0 %45 }
  0x8b   :  { %v43_v26 = vmul.f32 %v36_v20, %v30_v25  ;;  %v44_v27 = vmul.f32 %v40_v21, %v29_v24 }
  0x8d   :  { %v73_v30 = vmul.f32 %v71_v13, %v43_v26  ;;  %v74_v31 = vmul.f32 %v71_v13, %v44_v27  ;;  %v48_v33 = vpop.permute.xlu1 %47 }
  0x8e   :  { %v50_v34 = vsel %vm49_vm1, %v46_v32, %v48_v33  ;;  %v51_v35 = vsel %vm49_vm1, %v48_v33, %v46_v32  ;;  %v93_v44 = vpop.permute.xlu0 %92 }
  0x8f   :  { %v65_v38 = vmul.f32 %v58_v28, %v50_v34  ;;  %v66_v39 = vmul.f32 %v62_v29, %v51_v35  ;;  %v82_v42 = vadd.f32 %v80_v37, %v74_v31  ;;  %v81_v43 = vadd.f32 %v79_v36, %v73_v30 }
  0x91   :  { %v87_v40 = vmul.f32 %v85_v12, %v65_v38  ;;  %v88_v41 = vmul.f32 %v85_v12, %v66_v39  ;;  %v104_v51 = vpop.permute.xlu1 %103 }
  0x93   :  { %v90_v45 = vadd.f32 %v88_v41, %v82_v42  ;;  %v89_v46 = vadd.f32 %v87_v40, %v81_v43 }
  0x95   :  { %v96_v47 = vadd.f32 %v93_v44, %v90_v45  ;;  %v95_v48 = vadd.f32 %v93_v44, %v89_v46  ;;  %v109_v52 = vpop.permute.xlu1 %108 }
  0x97   :  { %118 = vmatprep.subr.mxu0 %v96_v47  ;;  %228 = vmatprep.subr.mxu1 %v96_v47 }
  0x98   :  { %119 = vmatpush1.msra.mxu0 %v95_v48  ;;  %229 = vmatpush1.msra.mxu1 %v95_v48 }
  0x99   :  { %226 = vmatmul.mubr.msk.f32.vlgmr.msra.gmra.mrb[0].mxu0 %vm111_vm2, %v97_v49  ;;  %227 = vmatmul.mubr.msk.f32.vlgmr.msra.gmra.mrb[0].mxu1 %vm111_vm2, %v98_v50 }
 0x16c   :  { %v184_v53 = vpop.f32.mrb[0].mxu0  ;;  %v190_v54 = vpop.f32.mrb[0].mxu1 }
 0x16d   :  { %v185_v55 = vadd.f32 %v184_v53, %v104_v51  ;;  %v191_v56 = vadd.f32 %v190_v54, %v109_v52  ;;  %v186_v57 = vpop.f32.mrb[1].mxu0  ;;  %v192_v58 = vpop.f32.mrb[1].mxu1 }
 0x16e   :  { %v187_v59 = vadd.f32 %v186_v57, %v104_v51  ;;  %v193_v60 = vadd.f32 %v192_v58, %v109_v52 }
 0x16f   :  { %243 = vtanh.f32 %v185_v55 }
 0x170   :  { %245 = vtanh.f32 %v191_v56 }
 0x171   :  { %247 = vtanh.f32 %v187_v59 }
 0x172   :  { %249 = vtanh.f32 %v193_v60 }
 0x179   :  { %v244_v61 = vpop.eup %243 }
 0x17a   :  { %v246_v62 = vpop.eup %245  ;;  %v208_v63 = vmul.f32 %v244_v61, %v244_v61 }
 0x17b   :  { %v248_v0 = vpop.eup %247  ;;  %v210_v1 = vmul.f32 %v246_v62, %v246_v62 }
 0x17c   :  { %v250_v2 = vpop.eup %249  ;;  %v199_v3 = vadd.f32 %v248_v0, %v244_v61  ;;  %v209_v4 = vmul.f32 %v248_v0, %v248_v0 }
 0x17d   :  { %v202_v5 = vadd.f32 %v250_v2, %v246_v62  ;;  %v211_v6 = vmul.f32 %v250_v2, %v250_v2 }
 0x17e   :  { %200 = vadd.xlane.f32.xlu0 %v199_v3  ;;  %v212_v7 = vadd.f32 %v209_v4, %v208_v63 }
 0x17f   :  { %203 = vadd.xlane.f32.xlu1 %v202_v5  ;;  %v215_v8 = vadd.f32 %v211_v6, %v210_v1 }
 0x182   :  { %213 = vadd.xlane.f32.xlu0 %v212_v7 }
 0x186   :  { %216 = vadd.xlane.f32.xlu0 %v215_v8 }
 0x20b   :  { %v201_v9 = vpop.xlane.xlu0 %200 }
 0x20c   :  { %v204_v10 = vpop.xlane.xlu1 %203  ;;  %206 = vst.msk [vmem:[%s332_s5] sm:$0xff] %vm205_vm3, %v201_v9 }
 0x20d   :  { %207 = vst.msk [vmem:[%s332_s5 + $0x8] sm:$0xff] %vm205_vm3, %v204_v10 }
 0x20f   :  { %v214_v11 = vpop.xlane.xlu0 %213 }
 0x210   :  { %219 = vst.msk [vmem:[%s332_s5] sm:$0xff] %vm218_vm4, %v214_v11 }
 0x213   :  { %v217_v12 = vpop.xlane.xlu0 %216 }
 0x214   :  { %220 = vst.msk [vmem:[%s332_s5 + $0x8] sm:$0xff] %vm218_vm4, %v217_v12 }

</bundles_post_ra>
